<compile_context>
chip_gen: v5e
topology: v5e:2x2
jax: 0.10.0
libtpu: 0.0.40
codegen_flags: <defaults>
</compile_context>

<pallas_src>
import functools
import math

import jax
import jax.numpy as jnp
import numpy as np
from jax.experimental import pallas as pl
from jax.experimental.pallas import tpu as pltpu

_LANE = 128
_SUBLANE = 8


def _round_up(x, m):
    return ((x + m - 1) // m) * m


def _layer_plan(network_dims):
    """Static packing plan for the fused, padded parameter slab.

    Layers = hidden layers + one fused (actor||critic) head with num_actions+1 outputs.
    Returns (plan, slab_rows, slab_cols) where plan[j] = (in_rows, col_off, col_width).
    Hidden activations are kept 128-lane padded.
    """
    obs_dim = network_dims[0]
    num_actions = network_dims[-1]
    outs = list(network_dims[1:-1]) + [num_actions + 1]  # fused head
    plan = []
    off = 0
    prev_width = obs_dim  # raw input width (x is NOT lane-padded; keeps its DMA small)
    for j, dout in enumerate(outs):
        width = _round_up(dout, _LANE)
        in_rows = prev_width if j == 0 else _round_up(prev_width, _SUBLANE)
        plan.append((in_rows, off, width))
        off += width
        prev_width = width
    slab_rows = _round_up(max(r for r, _, _ in plan), _SUBLANE)
    return plan, slab_rows, off


def init_params(network_dims, key):
    """PyTorch-style init U(-1/sqrt(fan_in), 1/sqrt(fan_in)); weights stored [in, out]."""
    params = []
    n = len(network_dims)
    for i in range(n - 2):
        fan_in, fan_out = network_dims[i], network_dims[i + 1]
        key, kw, kb = jax.random.split(key, 3)
        bound = 1.0 / math.sqrt(fan_in)
        w = jax.random.uniform(kw, (fan_in, fan_out), jnp.float32, -bound, bound)
        b = jax.random.uniform(kb, (1, fan_out), jnp.float32, -bound, bound)
        params.append((w, b))
    fan_in, n_act = network_dims[n - 2], network_dims[n - 1]
    bound = 1.0 / math.sqrt(fan_in)
    key, kw, kb = jax.random.split(key, 3)
    wa = jax.random.uniform(kw, (fan_in, n_act), jnp.float32, -bound, bound)
    ba = jax.random.uniform(kb, (1, n_act), jnp.float32, -bound, bound)
    key, kw, kb = jax.random.split(key, 3)
    wc = jax.random.uniform(kw, (fan_in, 1), jnp.float32, -bound, bound)
    bc = jax.random.uniform(kb, (1, 1), jnp.float32, -bound, bound)
    return params, (wa, ba), (wc, bc)


def pack_params(hidden_params, actor_params, critic_params, network_dims,
                matmul_dtype=jnp.float32):
    """Pack all layers into one padded weight slab + one bias slab.

    Weight slab: [slab_rows, 128*n_layers]; layer j lives at cols [off_j, off_j+width_j)
    with the true weight in the top-left [in_dim, out_dim] corner, zeros elsewhere.
    The last column block fuses actor (cols 0:num_actions) and critic (col num_actions).

    CORRECTNESS INVARIANT: padded hidden lanes carry sigmoid(0)=0.5 into the next
    layer, so every padded weight ROW (rows >= real fan_in) must be exactly zero.
    Guaranteed by construction here and asserted below.

    Note (v5e): keep matmul_dtype=float32 on v5e; bf16 is only worthwhile on v6e/v7x.
    """
    plan, rows, cols = _layer_plan(tuple(network_dims))
    W = np.zeros((rows, cols), np.float32)
    B = np.zeros((1, cols), np.float32)
    n_hidden = len(hidden_params)
    for j, (w, b) in enumerate(hidden_params):
        din, dout = w.shape
        _, off, _ = plan[j]
        W[:din, off:off + dout] = np.asarray(w, np.float32)
        B[0, off:off + dout] = np.asarray(b, np.float32).reshape(-1)
    wa, ba = actor_params
    wc, bc = critic_params
    din, n_act = wa.shape
    _, off, _ = plan[n_hidden]
    W[:din, off:off + n_act] = np.asarray(wa, np.float32)
    W[:din, off + n_act:off + n_act + 1] = np.asarray(wc, np.float32)
    B[0, off:off + n_act] = np.asarray(ba, np.float32).reshape(-1)
    B[0, off + n_act] = float(np.asarray(bc, np.float32).reshape(-1)[0])
    # Assert the zero-padded-row invariant for every layer fed by padded activations.
    dims = tuple(network_dims)
    for j in range(1, len(plan)):
        real_in = dims[j]
        _, offj, widthj = plan[j]
        assert not np.any(W[real_in:, offj:offj + widthj]), "padded weight rows must be zero"
    return jnp.asarray(W, dtype=matmul_dtype), jnp.asarray(B, dtype=jnp.float32)


def _make_kernel(plan, n_hidden, num_actions):
    """Fused forward: hidden sigmoid layers + fused actor/critic head + masked softmax."""

    def kernel(x_ref, w_ref, b_ref, out_ref):
        h = x_ref[...].astype(jnp.float32)                 # [tile_b, obs_dim]

        def layer(h, j):
            in_rows, off, width = plan[j]
            w = w_ref[0:in_rows, off:off + width]          # static, tile-aligned slice
            b = b_ref[0:1, off:off + width]                # f32 bias row
            # Activations cast to the slab dtype (bf16 optional); accumulate in f32.
            acc = jnp.dot(h.astype(w_ref.dtype), w, preferred_element_type=jnp.float32)
            return acc + b

        # Hidden layers: element-wise math stays f32 (no bf16 VPU/EUP path on v5e).
        for j in range(n_hidden):
            h = jax.nn.sigmoid(layer(h, j))                # [tile_b, 128] f32

        # Fused actor||critic head: lanes 0:num_actions = logits, lane num_actions =
        # state value, lanes beyond = exact zeros (zero-padded weights/bias).
        head = layer(h, n_hidden)                          # [tile_b, 128] f32

        # (1,128) lane mask, broadcast down the rows (no [tile_b,128] iota temporary).
        lane = jax.lax.broadcasted_iota(jnp.int32, (1, head.shape[-1]), 1)
        act_mask = lane < num_actions                      # (1, 128) bool

        # Numerically-stable softmax over the logical action lanes only.
        masked = jnp.where(act_mask, head, -1e30)          # Python literal: no captured consts
        m = jnp.max(masked, axis=-1, keepdims=True)
        e = jnp.exp(masked - m)                            # dead lanes underflow to 0
        denom = jnp.sum(e, axis=-1, keepdims=True)
        probs = e[:, :num_actions] / denom                 # exact division (probs feed sampling)

        # Narrow f32 output: lanes [0:A) = probs, lane A = value.  Only useful bytes
        # are written back to HBM; per-tile writeback is one contiguous range.
        out_ref[:, :num_actions] = probs
        out_ref[:, num_actions:num_actions + 1] = head[:, num_actions:num_actions + 1]

    return kernel


def _choose_tiling(batch, target_tile_b):
    """Grid-count-first tiling (review): cap padding waste, keep grid small, and use an
    even step count >= 2 whenever the batch can be split so both v7x TensorCores get
    work (harmless on single-TC v5e/v6e)."""
    steps = max(1, -(-batch // target_tile_b))             # ceil div
    if batch >= 2 * _SUBLANE:
        steps = max(steps, 2)
    if steps > 1 and steps % 2 == 1:
        steps += 1
    tile_b = _round_up(-(-batch // steps), _SUBLANE)
    return tile_b, steps


@functools.partial(jax.jit, static_argnames=("network_dims", "target_tile_b"))
def actor_critic_forward(x, w_slab, b_slab, *, network_dims, target_tile_b=1024):
    """Fused ActorCriticNN forward.

    x: [B, obs_dim] float32.  Returns (action_probs [B, num_actions], value [B, 1]).
    """
    network_dims = tuple(network_dims)
    obs_dim = network_dims[0]
    num_actions = network_dims[-1]
    n_hidden = len(network_dims) - 2
    plan, slab_rows, slab_cols = _layer_plan(network_dims)
    out_width = num_actions + 1

    batch = x.shape[0]
    tile_b, steps = _choose_tiling(batch, target_tile_b)
    b_pad = tile_b * steps
    if b_pad != batch:
        x = jnp.pad(x, ((0, b_pad - batch), (0, 0)))       # zero rows -> finite garbage, sliced off

    # Weight/bias slabs: constant block index -> fetched once, VMEM-resident across
    # the grid; Buffered(1) drops the redundant double-buffer copy.
    w_spec = pl.BlockSpec((slab_rows, slab_cols), lambda i: (0, 0),
                          pipeline_mode=pl.Buffered(1))
    b_spec = pl.BlockSpec((1, slab_cols), lambda i: (0, 0),
                          pipeline_mode=pl.Buffered(1))

    out = pl.pallas_call(
        _make_kernel(plan, n_hidden, num_actions),
        out_shape=jax.ShapeDtypeStruct((b_pad, out_width), jnp.float32),
        grid=(steps,),
        in_specs=[
            pl.BlockSpec((tile_b, obs_dim), lambda i: (i, 0)),   # x streams per batch tile
            w_spec,
            b_spec,
        ],
        out_specs=pl.BlockSpec((tile_b, out_width), lambda i: (i, 0)),
        compiler_params=pltpu.CompilerParams(
            dimension_semantics=("parallel",)),            # even grid -> balanced 2-TC on v7x
    )(x, w_slab, b_slab)

    action = out[:batch, :num_actions]
    value = out[:batch, num_actions:out_width]
    return action, value


def _reference_forward(x, hidden_params, actor_params, critic_params,
                       matmul_dtype=jnp.float32):
    """Pure-JAX reference mirroring the PyTorch forward (same matmul dtype as kernel)."""
    def mm(a, b):
        return jnp.dot(a.astype(matmul_dtype), b.astype(matmul_dtype),
                       preferred_element_type=jnp.float32)
    h = x
    for (w, b) in hidden_params:
        h = jax.nn.sigmoid(mm(h, w) + b)
    logits = mm(h, actor_params[0]) + actor_params[1]
    action = jax.nn.softmax(logits, axis=-1)
    value = mm(h, critic_params[0]) + critic_params[1]
    return action, value


if __name__ == "__main__":
    # Lunar Lander-style dims: obs=8, two hidden layers of 32, 4 actions.
    # TODO(synk): episode_actions/episode_rewards bookkeeping and the numpy->tensor
    # conversion in the PyTorch forward are host-side and not part of the kernel.
    network_dims = (8, 32, 32, 4)

    key = jax.random.PRNGKey(0)
    key, pkey, xkey1, xkey2 = jax.random.split(key, 4)
    hidden_params, actor_params, critic_params = init_params(network_dims, pkey)

    # ---- Path 1: tiny batch, f32 slab (recommended on v5e) -> tight validation ----
    x_small = jax.random.normal(xkey1, (2, network_dims[0]), dtype=jnp.float32)
    w_f32, b_f32 = pack_params(hidden_params, actor_params, critic_params,
                               network_dims, jnp.float32)
    action, value = actor_critic_forward(x_small, w_f32, b_f32,
                                         network_dims=network_dims)
    jax.block_until_ready((action, value))

    ref_a, ref_v = _reference_forward(x_small, hidden_params, actor_params, critic_params)
    np.testing.assert_allclose(np.asarray(action), np.asarray(ref_a), rtol=1e-5, atol=1e-5)
    np.testing.assert_allclose(np.asarray(value), np.asarray(ref_v), rtol=1e-5, atol=1e-5)
    np.testing.assert_allclose(np.asarray(action).sum(axis=-1),
                               np.ones(x_small.shape[0]), rtol=1e-5, atol=1e-5)

    # ---- Path 2: batched (even grid of 2 tiles), bf16 slab (v6e/v7x option) ----
    x_big = jax.random.normal(xkey2, (1024, network_dims[0]), dtype=jnp.float32)
    w_bf16, b_bf16 = pack_params(hidden_params, actor_params, critic_params,
                                 network_dims, jnp.bfloat16)
    action_b, value_b = actor_critic_forward(x_big, w_bf16, b_bf16,
                                             network_dims=network_dims)
    jax.block_until_ready((action_b, value_b))

    ref_ab, ref_vb = _reference_forward(x_big, hidden_params, actor_params,
                                        critic_params, jnp.bfloat16)
    np.testing.assert_allclose(np.asarray(action_b), np.asarray(ref_ab),
                               rtol=5e-3, atol=5e-3)
    np.testing.assert_allclose(np.asarray(value_b), np.asarray(ref_vb),
                               rtol=2e-2, atol=2e-2)
    np.testing.assert_allclose(np.asarray(action_b).sum(axis=-1),
                               np.ones(x_big.shape[0]), rtol=5e-3, atol=5e-3)

    print("KERNEL_OK")
</pallas_src>

<mosaic_0001>
module attributes {stable_mosaic.version = 11 : i64} {
  func.func @kernel(%arg0: i32, %arg1: memref<8x8xf32, #tpu.memory_space<vmem>>, %arg2: memref<128x384xf32, #tpu.memory_space<vmem>>, %arg3: memref<1x384xf32, #tpu.memory_space<vmem>>, %arg4: memref<8x5xf32, #tpu.memory_space<vmem>>) attributes {dimension_semantics = [#tpu.dimension_semantics<parallel>], iteration_bounds = array<i64: 1>, scalar_prefetch = 0 : i64, scratch_operands = 0 : i64, tpu.core_type = #tpu.core_type<tc>, window_params = [{transform_indices = @transform_0, window_bounds = array<i64: 8, 8>}, {pipeline_mode = #tpu.pipeline_mode<synchronous>, transform_indices = @transform_1, window_bounds = array<i64: 128, 384>}, {pipeline_mode = #tpu.pipeline_mode<synchronous>, transform_indices = @transform_2, window_bounds = array<i64: 1, 384>}, {transform_indices = @transform_3, window_bounds = array<i64: 8, 5>}]} {
    %c0 = arith.constant 0 : index
    %c0_0 = arith.constant 0 : index
    %0 = vector.load %arg1[%c0, %c0_0] : memref<8x8xf32, #tpu.memory_space<vmem>>, vector<8x8xf32>
    %c0_1 = arith.constant 0 : index
    %c0_2 = arith.constant 0 : index
    %1 = vector.load %arg2[%c0_1, %c0_2] : memref<128x384xf32, #tpu.memory_space<vmem>>, vector<8x128xf32>
    %c0_3 = arith.constant 0 : index
    %c0_4 = arith.constant 0 : index
    %2 = vector.load %arg3[%c0_3, %c0_4] : memref<1x384xf32, #tpu.memory_space<vmem>>, vector<1x128xf32>
    %cst = arith.constant dense<0.000000e+00> : vector<8x128xf32>
    %3 = tpu.matmul %0, %1, %cst {dimension_numbers = #tpu.dot_dimension_numbers<[1], [0], [0], [1], [0, 0, 1, 1], [], []>} : vector<8x8xf32>, vector<8x128xf32>, vector<8x128xf32> -> vector<8x128xf32>
    %4 = vector.broadcast %2 : vector<1x128xf32> to vector<8x128xf32>
    %5 = arith.addf %3, %4 : vector<8x128xf32>
    %6 = arith.negf %5 : vector<8x128xf32>
    %7 = math.exp %6 : vector<8x128xf32>
    %cst_5 = arith.constant 1.000000e+00 : f32
    %8 = vector.broadcast %cst_5 : f32 to vector<8x128xf32>
    %9 = arith.addf %8, %7 : vector<8x128xf32>
    %10 = arith.divf %8, %9 : vector<8x128xf32>
    %c0_6 = arith.constant 0 : index
    %c128 = arith.constant 128 : index
    %11 = vector.load %arg2[%c0_6, %c128] : memref<128x384xf32, #tpu.memory_space<vmem>>, vector<128x128xf32>
    %c0_7 = arith.constant 0 : index
    %c128_8 = arith.constant 128 : index
    %12 = vector.load %arg3[%c0_7, %c128_8] : memref<1x384xf32, #tpu.memory_space<vmem>>, vector<1x128xf32>
    %cst_9 = arith.constant dense<0.000000e+00> : vector<8x128xf32>
    %13 = tpu.matmul %10, %11, %cst_9 {dimension_numbers = #tpu.dot_dimension_numbers<[1], [0], [0], [1], [0, 0, 1, 1], [], []>} : vector<8x128xf32>, vector<128x128xf32>, vector<8x128xf32> -> vector<8x128xf32>
    %14 = vector.broadcast %12 : vector<1x128xf32> to vector<8x128xf32>
    %15 = arith.addf %13, %14 : vector<8x128xf32>
    %16 = arith.negf %15 : vector<8x128xf32>
    %17 = math.exp %16 : vector<8x128xf32>
    %cst_10 = arith.constant 1.000000e+00 : f32
    %18 = vector.broadcast %cst_10 : f32 to vector<8x128xf32>
    %19 = arith.addf %18, %17 : vector<8x128xf32>
    %20 = arith.divf %18, %19 : vector<8x128xf32>
    %c0_11 = arith.constant 0 : index
    %c256 = arith.constant 256 : index
    %21 = vector.load %arg2[%c0_11, %c256] : memref<128x384xf32, #tpu.memory_space<vmem>>, vector<128x128xf32>
    %c0_12 = arith.constant 0 : index
    %c256_13 = arith.constant 256 : index
    %22 = vector.load %arg3[%c0_12, %c256_13] : memref<1x384xf32, #tpu.memory_space<vmem>>, vector<1x128xf32>
    %cst_14 = arith.constant dense<0.000000e+00> : vector<8x128xf32>
    %23 = tpu.matmul %20, %21, %cst_14 {dimension_numbers = #tpu.dot_dimension_numbers<[1], [0], [0], [1], [0, 0, 1, 1], [], []>} : vector<8x128xf32>, vector<128x128xf32>, vector<8x128xf32> -> vector<8x128xf32>
    %24 = vector.broadcast %22 : vector<1x128xf32> to vector<8x128xf32>
    %25 = arith.addf %23, %24 : vector<8x128xf32>
    %26 = tpu.iota {dimensions = array<i32: 1>} : vector<1x128xi32>
    %c4_i32 = arith.constant 4 : i32
    %27 = vector.broadcast %c4_i32 : i32 to vector<1x128xi32>
    %28 = arith.cmpi slt, %26, %27 : vector<1x128xi32>
    %cst_15 = arith.constant -1.000000e+30 : f32
    %29 = vector.shape_cast %28 : vector<1x128xi1> to vector<1x128xi1>
    %30 = vector.broadcast %29 : vector<1x128xi1> to vector<8x128xi1>
    %31 = vector.broadcast %cst_15 : f32 to vector<8x128xf32>
    %32 = arith.select %30, %25, %31 : vector<8x128xi1>, vector<8x128xf32>
    %cst_16 = arith.constant dense<0xFF800000> : vector<8xf32>
    %33 = vector.multi_reduction <maximumf>, %32, %cst_16 [1] : vector<8x128xf32> to vector<8xf32>
    %34 = vector.shape_cast %33 : vector<8xf32> to vector<8x1xf32>
    %35 = vector.broadcast %34 : vector<8x1xf32> to vector<8x128xf32>
    %36 = arith.subf %32, %35 : vector<8x128xf32>
    %37 = math.exp %36 : vector<8x128xf32>
    %cst_17 = arith.constant dense<0.000000e+00> : vector<8xf32>
    %38 = vector.multi_reduction <add>, %37, %cst_17 [1] : vector<8x128xf32> to vector<8xf32>
    %39 = vector.shape_cast %38 : vector<8xf32> to vector<8x1xf32>
    %40 = vector.extract_strided_slice %37 {offsets = [0, 0], sizes = [8, 4], strides = [1, 1]} : vector<8x128xf32> to vector<8x4xf32>
    %41 = vector.broadcast %39 : vector<8x1xf32> to vector<8x4xf32>
    %42 = arith.divf %40, %41 : vector<8x4xf32>
    %c0_18 = arith.constant 0 : index
    %c0_19 = arith.constant 0 : index
    %43 = vector.load %arg4[%c0_18, %c0_19] : memref<8x5xf32, #tpu.memory_space<vmem>>, vector<8x4xf32>
    tpu.vector_store %arg4[%c0_18, %c0_19], %42 {strides = array<i32>} : memref<8x5xf32, #tpu.memory_space<vmem>>, vector<8x4xf32>,
    %44 = vector.extract_strided_slice %25 {offsets = [0, 4], sizes = [8, 1], strides = [1, 1]} : vector<8x128xf32> to vector<8x1xf32>
    %c0_20 = arith.constant 0 : index
    %c4 = arith.constant 4 : index
    %45 = vector.load %arg4[%c0_20, %c4] : memref<8x5xf32, #tpu.memory_space<vmem>>, vector<8x1xf32>
    tpu.vector_store %arg4[%c0_20, %c4], %44 {strides = array<i32>} : memref<8x5xf32, #tpu.memory_space<vmem>>, vector<8x1xf32>,
    return
  }
  func.func @transform_0(%arg0: i32) -> (i32, i32) {
    %c0_i32 = arith.constant 0 : i32
    %c0_i32_0 = arith.constant 0 : i32
    return %arg0, %c0_i32 : i32, i32
  }
  func.func @transform_1(%arg0: i32) -> (i32, i32) {
    %c0_i32 = arith.constant 0 : i32
    %c0_i32_0 = arith.constant 0 : i32
    %c0_i32_1 = arith.constant 0 : i32
    return %c0_i32, %c0_i32_0 : i32, i32
  }
  func.func @transform_2(%arg0: i32) -> (i32, i32) {
    %c0_i32 = arith.constant 0 : i32
    %c0_i32_0 = arith.constant 0 : i32
    %c0_i32_1 = arith.constant 0 : i32
    return %c0_i32, %c0_i32_0 : i32, i32
  }
  func.func @transform_3(%arg0: i32) -> (i32, i32) {
    %c0_i32 = arith.constant 0 : i32
    %c0_i32_0 = arith.constant 0 : i32
    return %arg0, %c0_i32 : i32, i32
  }
}

</mosaic_0001>

<bundles_post_ra>
// kernel: actor_critic_forward.1
= control target key start
LH: loop header
LB: loop body
LE: loop exit
PB: predicated region body
PF: predicated region fallthrough
CT: control target
= control target key end

     0   :  { %8 = vsyncpa [#allocation3], 0  ;;  %s262_s15 = smov [#allocation2]   ;;  %s263_s17 = smov 384   ;;  %s306_s0 = inlined_call_operand.vmem [shape: f32[8,8], index: 0, kind: input, shape index: {}]   ;;  %s307_s1 = inlined_call_operand.hbm [shape: f32[128,384], index: 1, kind: input, shape index: {}]   ;;  %s308_s2 = inlined_call_operand.vmem [shape: f32[1,384], index: 2, kind: input, shape index: {}]   ;;  %s309_s3 = inlined_call_operand.vmem [shape: f32[8,5], index: 3, kind: output, shape index: {}]  }
   0x1   :  { %s15_s14 = sshll.u32 %s307_s1, 4  ;;  %s17_s16 = sshll.u32 %s262_s15, 4  ;;  %s16_s14 = int_to_ptr.hbm [resolvable:$true] %s15_s14  ;;  %s18_s16 = int_to_ptr.vmem [resolvable:$true] %s17_s16 }
   0x2   :  { %s264_s18 = smov 24  }
   0x3   :  { %23 = dma.hbm_to_vmem [thread:$0]  %s16_s14, 6144, %s18_s16, [#allocation3], %s263_s17, %s263_s17, %s264_s18  }
   0x4   :  { %260 = dma.done.wait [#allocation3], 6144  }
   0x5   :  { %261 = vsyncadd [#allocation3], 4294961152  ;;  %vm36_vm0 = vcmask 64512   ;;  %v31_v0 = vld [vmem:[#allocation2] sm:$0xff]  ;;  %v94_v2 = vld [vmem:[#allocation2 + $0x170] sm:$0xff]  ;;  %vm206_vm14 = vcmask 31744  }
   0x6   :  { %v30_v1 = vld [vmem:[%s306_s0] sm:$0xff]  ;;  %55 = vmatpush.msra.mxu0 %v31_v0  ;;  %99 = vmatpush.msra.mxu1 %v94_v2  ;;  %v93_v3 = vld [vmem:[#allocation2 + $0x158] sm:$0xff]  ;;  %v91_v5 = vld [vmem:[#allocation2 + $0x128] sm:$0xff]  ;;  %v178_v2 = vlaneseq  ;;  %vm208_vm15 = vcmask 39968  }
   0x7   :  { %215 = vmatmul.msk.f32.vlgmr.msra.gmra.mxu0 %vm36_vm0, %v30_v1  ;;  %v92_v4 = vld [vmem:[#allocation2 + $0x140] sm:$0xff]  ;;  %v90_v6 = vld [vmem:[#allocation2 + $0x110] sm:$0xff]  ;;  %v89_v7 = vld [vmem:[#allocation2 + $0xf8] sm:$0xff] }
   0x8   :  { %100 = vmatpush.msra.mxu1 %v93_v3  ;;  %v88_v8 = vld [vmem:[#allocation2 + $0xe0] sm:$0xff]  ;;  %v87_v9 = vld [vmem:[#allocation2 + $0xc8] sm:$0xff]  ;;  %v86_v10 = vld [vmem:[#allocation2 + $0xb0] sm:$0xff]  ;;  %v179_v3 = vand.u32 127, %v178_v2 }
   0x9   :  { %v85_v11 = vld [vmem:[#allocation2 + $0x98] sm:$0xff]  ;;  %v84_v12 = vld [vmem:[#allocation2 + $0x80] sm:$0xff]  ;;  %v83_v13 = vld [vmem:[#allocation2 + $0x68] sm:$0xff] }
   0xa   :  { %101 = vmatpush.msra.mxu1 %v92_v4  ;;  %v82_v14 = vld [vmem:[#allocation2 + $0x50] sm:$0xff]  ;;  %v81_v15 = vld [vmem:[#allocation2 + $0x38] sm:$0xff]  ;;  %v80_v16 = vld [vmem:[#allocation2 + $0x20] sm:$0xff]  ;;  %vm180_vm9 = vcmp.lt.s32.totalorder %v179_v3, 4 }
   0xb   :  { %v79_v17 = vld [vmem:[#allocation2 + $0x8] sm:$0xff]  ;;  %v221_v18 = vld [vmem:[%s308_s2] ss:$0 sm:$0xff]  ;;  %v153_v34 = vld [vmem:[#allocation2 + $0x178] sm:$0xff] }
   0xc   :  { %102 = vmatpush.msra.mxu1 %v91_v5  ;;  %158 = vmatpush.msra.mxu2 %v153_v34  ;;  %v152_v35 = vld [vmem:[#allocation2 + $0x160] sm:$0xff]  ;;  %v151_v36 = vld [vmem:[#allocation2 + $0x148] sm:$0xff]  ;;  %v150_v37 = vld [vmem:[#allocation2 + $0x130] sm:$0xff] }
   0xd   :  { %v149_v38 = vld [vmem:[#allocation2 + $0x118] sm:$0xff]  ;;  %v148_v39 = vld [vmem:[#allocation2 + $0x100] sm:$0xff]  ;;  %v147_v40 = vld [vmem:[#allocation2 + $0xe8] sm:$0xff] }
   0xe   :  { %103 = vmatpush.msra.mxu1 %v90_v6  ;;  %159 = vmatpush.msra.mxu2 %v152_v35  ;;  %v146_v41 = vld [vmem:[#allocation2 + $0xd0] sm:$0xff]  ;;  %v145_v42 = vld [vmem:[#allocation2 + $0xb8] sm:$0xff]  ;;  %v144_v43 = vld [vmem:[#allocation2 + $0xa0] sm:$0xff] }
   0xf   :  { %v143_v44 = vld [vmem:[#allocation2 + $0x88] sm:$0xff]  ;;  %v142_v45 = vld [vmem:[#allocation2 + $0x70] sm:$0xff]  ;;  %v141_v46 = vld [vmem:[#allocation2 + $0x58] sm:$0xff] }
  0x10   :  { %104 = vmatpush.msra.mxu1 %v89_v7  ;;  %160 = vmatpush.msra.mxu2 %v151_v36  ;;  %v140_v47 = vld [vmem:[#allocation2 + $0x40] sm:$0xff]  ;;  %v139_v48 = vld [vmem:[#allocation2 + $0x28] sm:$0xff]  ;;  %v138_v49 = vld [vmem:[#allocation2 + $0x10] sm:$0xff] }
  0x11   :  { %v222_v50 = vld [vmem:[%s308_s2 + $0x1] ss:$0 sm:$0xff]  ;;  %v223_v4 = vld [vmem:[%s308_s2 + $0x2] ss:$0 sm:$0xff] }
  0x12   :  { %105 = vmatpush.msra.mxu1 %v88_v8  ;;  %161 = vmatpush.msra.mxu2 %v150_v37 }
  0x14   :  { %106 = vmatpush.msra.mxu1 %v87_v9  ;;  %162 = vmatpush.msra.mxu2 %v149_v38 }
  0x16   :  { %107 = vmatpush.msra.mxu1 %v86_v10  ;;  %163 = vmatpush.msra.mxu2 %v148_v39 }
  0x18   :  { %108 = vmatpush.msra.mxu1 %v85_v11  ;;  %164 = vmatpush.msra.mxu2 %v147_v40 }
  0x1a   :  { %109 = vmatpush.msra.mxu1 %v84_v12  ;;  %165 = vmatpush.msra.mxu2 %v146_v41 }
  0x1c   :  { %110 = vmatpush.msra.mxu1 %v83_v13  ;;  %166 = vmatpush.msra.mxu2 %v145_v42 }
  0x1e   :  { %111 = vmatpush.msra.mxu1 %v82_v14  ;;  %167 = vmatpush.msra.mxu2 %v144_v43 }
  0x20   :  { %112 = vmatpush.msra.mxu1 %v81_v15  ;;  %168 = vmatpush.msra.mxu2 %v143_v44 }
  0x22   :  { %113 = vmatpush.msra.mxu1 %v80_v16  ;;  %169 = vmatpush.msra.mxu2 %v142_v45 }
  0x24   :  { %114 = vmatpush.msra.mxu1 %v79_v17  ;;  %170 = vmatpush.msra.mxu2 %v141_v46 }
  0x26   :  { %171 = vmatpush.msra.mxu2 %v140_v47 }
  0x28   :  { %172 = vmatpush.msra.mxu2 %v139_v48 }
  0x2a   :  { %173 = vmatpush.msra.mxu2 %v138_v49 }
  0x84   :  { %v57_v19 = vpop.f32.mrf.mxu0 }
  0x85   :  { %v58_v20 = vadd.f32 %v221_v18, %v57_v19 }
  0x87   :  { %v216_v21 = vmul.f32 -1.442695, %v58_v20 }
  0x89   :  { %224 = vpow2.f32 %v216_v21 }
  0x8f   :  { %v225_v22 = vpop.eup %224 }
  0x90   :  { %v63_v23 = vadd.f32 1.0, %v225_v22 }
  0x92   :  { %226 = vrcp.f32 %v63_v23  ;;  %v75_v27 = vand.u32 2147483648, %v63_v23  ;;  %v73_v29 = vand.u32 2147483647, %v63_v23  ;;  %vm69_vm2 = vweird.f32 %v63_v23 }
  0x94   :  { %v76_v31 = vor.u32 1.1754944e-38, %v75_v27  ;;  %vm74_vm4 = vcmp.eq.f32.partialorder %v73_v29, 8.507059e+37 }
  0x98   :  { %v227_v24 = vpop.eup %226 }
  0x99   :  { %v65_v25 = vmul.f32 %v227_v24, %v63_v23  ;;  %vm70_vm1 = vweird.f32 %v227_v24 }
  0x9a   :  { %vm71_vm3 = vmor %vm69_vm2, %vm70_vm1 }
  0x9b   :  { %v66_v26 = vsub.f32 1.0, %v65_v25 }
  0x9d   :  { %v67_v28 = vmul.f32 %v227_v24, %v66_v26 }
  0x9f   :  { %v68_v30 = vadd.f32 %v227_v24, %v67_v28 }
  0xa1   :  { %v72_v32 = vsel %vm71_vm3, %v227_v24, %v68_v30 }
  0xa2   :  { %v77_v33 = vsel %vm74_vm4, %v76_v31, %v72_v32 }
  0xa3   :  { %115 = vmatmul.f32.vlgmr.msra.gmra.mxu1 %v77_v33 }
 0x120   :  { %v116_v51 = vpop.f32.mrf.mxu1 }
 0x121   :  { %v117_v52 = vadd.f32 %v222_v50, %v116_v51 }
 0x123   :  { %v217_v53 = vmul.f32 -1.442695, %v117_v52 }
 0x125   :  { %228 = vpow2.f32 %v217_v53 }
 0x12b   :  { %v229_v54 = vpop.eup %228 }
 0x12c   :  { %v122_v55 = vadd.f32 1.0, %v229_v54 }
 0x12e   :  { %230 = vrcp.f32 %v122_v55  ;;  %v134_v59 = vand.u32 2147483648, %v122_v55  ;;  %v132_v61 = vand.u32 2147483647, %v122_v55  ;;  %vm128_vm6 = vweird.f32 %v122_v55 }
 0x130   :  { %v135_v63 = vor.u32 1.1754944e-38, %v134_v59  ;;  %vm133_vm8 = vcmp.eq.f32.partialorder %v132_v61, 8.507059e+37 }
 0x134   :  { %v231_v56 = vpop.eup %230 }
 0x135   :  { %v124_v57 = vmul.f32 %v231_v56, %v122_v55  ;;  %vm129_vm5 = vweird.f32 %v231_v56 }
 0x136   :  { %vm130_vm7 = vmor %vm128_vm6, %vm129_vm5 }
 0x137   :  { %v125_v58 = vsub.f32 1.0, %v124_v57 }
 0x139   :  { %v126_v60 = vmul.f32 %v231_v56, %v125_v58 }
 0x13b   :  { %v127_v62 = vadd.f32 %v231_v56, %v126_v60 }
 0x13d   :  { %v131_v0 = vsel %vm130_vm7, %v231_v56, %v127_v62 }
 0x13e   :  { %v136_v1 = vsel %vm133_vm8, %v135_v63, %v131_v0 }
 0x13f   :  { %174 = vmatmul.f32.vlgmr.msra.gmra.mxu2 %v136_v1 }
 0x1c2   :  { %v175_v5 = vpop.f32.mrf.mxu2 }
 0x1c3   :  { %v176_v6 = vadd.f32 %v223_v4, %v175_v5 }
 0x1c5   :  { %v183_v7 = vsel %vm180_vm9, %v176_v6, -1e+30 }
 0x1c6   :  { %184 = vmax.xlane.f32.xlu0 %v183_v7 }
 0x239   :  { %v185_v8 = vpop.xlane.xlu0 %184 }
 0x23a   :  { %v186_v9 = vsub.f32 %v183_v7, %v185_v8 }
 0x23c   :  { %v187_v10 = vmul.f32 1.442695, %v186_v9 }
 0x23e   :  { %232 = vpow2.f32 %v187_v10 }
 0x244   :  { %v233_v11 = vpop.eup %232 }
 0x245   :  { %189 = vadd.xlane.f32.xlu0 %v233_v11 }
 0x2b8   :  { %v190_v12 = vpop.xlane.xlu0 %189 }
 0x2b9   :  { %234 = vrcp.f32 %v190_v12  ;;  %v202_v16 = vand.u32 2147483648, %v190_v12  ;;  %v200_v18 = vand.u32 2147483647, %v190_v12  ;;  %vm196_vm11 = vweird.f32 %v190_v12 }
 0x2bb   :  { %v203_v20 = vor.u32 1.1754944e-38, %v202_v16  ;;  %vm201_vm13 = vcmp.eq.f32.partialorder %v200_v18, 8.507059e+37 }
 0x2bf   :  { %v235_v13 = vpop.eup %234 }
 0x2c0   :  { %v192_v14 = vmul.f32 %v235_v13, %v190_v12  ;;  %vm197_vm10 = vweird.f32 %v235_v13 }
 0x2c1   :  { %vm198_vm12 = vmor %vm196_vm11, %vm197_vm10 }
 0x2c2   :  { %v193_v15 = vsub.f32 1.0, %v192_v14 }
 0x2c4   :  { %v194_v17 = vmul.f32 %v235_v13, %v193_v15 }
 0x2c6   :  { %v195_v19 = vadd.f32 %v235_v13, %v194_v17 }
 0x2c8   :  { %v199_v21 = vsel %vm198_vm12, %v235_v13, %v195_v19 }
 0x2c9   :  { %v204_v22 = vsel %vm201_vm13, %v203_v20, %v199_v21 }
 0x2ca   :  { %v205_v23 = vmul.f32 %v233_v11, %v204_v22 }
 0x2cc   :  { %207 = vst.msk [vmem:[%s309_s3] sm:$0xff] %vm206_vm14, %v205_v23 }
 0x2cd   :  { %209 = vst.msk [vmem:[%s309_s3] sm:$0xff] %vm208_vm15, %v176_v6 }
 0x2ce   :  { %214 = vsyncpa [#allocation3], 1 }

</bundles_post_ra>
